<compile_context>
chip_gen: v7x
topology: tpu7x:2x2x1
jax: 0.10.0
libtpu: 0.0.40
codegen_flags: <defaults>
</compile_context>

<pallas_src>
import jax
import jax.numpy as jnp
from jax import lax
from jax.experimental import pallas as pl
from jax.experimental.pallas import tpu as pltpu


def _round_up(x, m):
    return ((x + m - 1) // m) * m


def _sublane(dtype):
    # Packed sublane requirement for the second-to-last block dim.
    return {4: 8, 2: 16, 1: 32}.get(jnp.dtype(dtype).itemsize, 8)


def _pick_tile(dim, target, base):
    """Pad `dim` to a multiple of `base`, then pick the largest tile that is a
    multiple of `base`, <= target, and exactly divides the padded dim (so no
    grid step ever works on pure zero padding)."""
    dim_p = _round_up(max(dim, 1), base)
    target = max(base, min(_round_up(target, base), dim_p))
    tile = base
    t = target
    while t >= base:
        if dim_p % t == 0:
            tile = t
            break
        t -= base
    return tile, dim_p


def _mm_f32(x_tile, w_tile):
    # x_tile: (tm, tk), w_tile: (tn, tk) in torch (N, K) layout.
    # Contract the K (last) dims of both -> (tm, tn); no transpose needed.
    return lax.dot_general(
        x_tile,
        w_tile,
        dimension_numbers=(((1,), (1,)), ((), ())),
        preferred_element_type=jnp.float32,
    )


def _meta_linear_kernel_f32out(x_ref, w_ref, b_ref, o_ref):
    # f32 output: accumulate straight into the resident output block.
    k = pl.program_id(2)

    @pl.when(k == 0)
    def _():
        o_ref[...] = jnp.zeros_like(o_ref)

    o_ref[...] += _mm_f32(x_ref[...], w_ref[...])

    @pl.when(k == pl.num_programs(2) - 1)
    def _():
        o_ref[...] += b_ref[...].astype(o_ref.dtype)


def _meta_linear_kernel_scratch(x_ref, w_ref, b_ref, o_ref, acc_ref):
    # Low-precision output: f32 VMEM accumulator, cast on the last K step.
    k = pl.program_id(2)

    @pl.when(k == 0)
    def _():
        acc_ref[...] = jnp.zeros_like(acc_ref)

    acc_ref[...] += _mm_f32(x_ref[...], w_ref[...])

    @pl.when(k == pl.num_programs(2) - 1)
    def _():
        o_ref[...] = (acc_ref[...] + b_ref[...].astype(jnp.float32)).astype(o_ref.dtype)


def _tpu_vmem_capacity():
    try:
        return int(pltpu.get_tpu_info().vmem_capacity_bytes)
    except Exception:
        return 64 << 20  # conservative (v7x-sized) fallback


def meta_linear(x, weight, bias, *, tm=None, tn=None, tk=None, cast_to_bf16=False):
    """Pallas equivalent of MetaLinear.forward (F.linear(x, weight, bias)).

    x      : (..., in_features)
    weight : (out_features, in_features)   (torch nn.Linear layout, NOT transposed)
    bias   : (out_features,)
    returns: (..., out_features), dtype of x
    """
    orig_shape = x.shape
    K = orig_shape[-1]
    N, Kw = weight.shape
    assert K == Kw, "weight in_features must match x last dim"

    out_dtype = x.dtype
    x2d = x.reshape(-1, K)
    M = x2d.shape[0]

    # Optional bf16 MXU path (f32 accumulation preserved inside the kernel).
    if cast_to_bf16:
        x2d = x2d.astype(jnp.bfloat16)
        weight = weight.astype(jnp.bfloat16)

    vmem_cap = _tpu_vmem_capacity()

    # Per-generation tile targets (sweepable).
    if vmem_cap <= (64 << 20):        # v7x: 64 MiB VMEM per TensorCore
        tm_d, tn_d, tk_d = 256, 512, 512
    else:                             # v5e / v6e: 128 MiB VMEM
        tm_d, tn_d, tk_d = 512, 512, 512
    tm = tm_d if tm is None else tm
    tn = tn_d if tn is None else tn
    tk = tk_d if tk is None else tk

    sub_m = max(_sublane(x2d.dtype), _sublane(out_dtype))
    sub_n = max(_sublane(weight.dtype), 1)

    # Divisor-aware tiling: pad only to alignment, tile divides the padded dim.
    tm_eff, Mp = _pick_tile(M, tm, sub_m)
    tn_eff, Np = _pick_tile(N, tn, max(128, sub_n))
    tk_eff, Kp = _pick_tile(K, tk, 128)

    # v7x megacore: make sure a "parallel" axis has >= 2 blocks when possible.
    if (Mp // tm_eff) * (Np // tn_eff) == 1 and Np >= 2 * 128:
        tn_eff, Np = _pick_tile(N, max(128, Np // 2), 128)

    # Pad only when actually needed (no per-call weight transpose, ever).
    x_p = x2d if (Mp == M and Kp == K) else jnp.pad(x2d, ((0, Mp - M), (0, Kp - K)))
    w_p = weight if (Np == N and Kp == K) else jnp.pad(weight, ((0, Np - N), (0, Kp - K)))
    b_p = bias if Np == N else jnp.pad(bias, (0, Np - N))
    b_p = b_p.reshape(1, Np)

    grid = (Mp // tm_eff, Np // tn_eff, Kp // tk_eff)

    use_scratch = jnp.dtype(out_dtype) != jnp.dtype(jnp.float32)
    kernel = _meta_linear_kernel_scratch if use_scratch else _meta_linear_kernel_f32out
    scratch_shapes = (
        [pltpu.VMEM((tm_eff, tn_eff), jnp.float32)] if use_scratch else []
    )

    x_it = jnp.dtype(x_p.dtype).itemsize
    w_it = jnp.dtype(w_p.dtype).itemsize
    b_it = jnp.dtype(b_p.dtype).itemsize
    o_it = jnp.dtype(out_dtype).itemsize

    bytes_accessed = (
        x_p.size * x_it + w_p.size * w_it + b_p.size * b_it + Mp * Np * o_it
    )
    cost = pl.CostEstimate(
        flops=2 * M * N * K, transcendentals=0, bytes_accessed=int(bytes_accessed)
    )

    # Double-buffered input/output tiles (+ f32 accumulator if used).
    tile_bytes = (
        2 * (tm_eff * tk_eff * x_it + tn_eff * tk_eff * w_it + tn_eff * b_it)
        + 2 * tm_eff * tn_eff * o_it
        + (tm_eff * tn_eff * 4 if use_scratch else 0)
    )
    cap_budget = min(vmem_cap - (8 << 20), 100 << 20)          # ~56 MiB v7x, 100 MiB v5e/v6e
    vmem_limit = int(min(cap_budget, max(tile_bytes + (8 << 20), 32 << 20)))
    vmem_limit = max(vmem_limit, tile_bytes + (2 << 20))

    out = pl.pallas_call(
        kernel,
        out_shape=jax.ShapeDtypeStruct((Mp, Np), out_dtype),
        grid_spec=pltpu.PrefetchScalarGridSpec(
            num_scalar_prefetch=0,
            grid=grid,
            in_specs=[
                pl.BlockSpec((tm_eff, tk_eff), lambda i, j, k: (i, k)),  # x tile
                pl.BlockSpec((tn_eff, tk_eff), lambda i, j, k: (j, k)),  # W tile (N,K layout)
                pl.BlockSpec((1, tn_eff), lambda i, j, k: (0, j)),       # bias tile
            ],
            out_specs=pl.BlockSpec((tm_eff, tn_eff), lambda i, j, k: (i, j)),
            scratch_shapes=scratch_shapes,
        ),
        compiler_params=pltpu.CompilerParams(
            dimension_semantics=("parallel", "parallel", "arbitrary"),
            vmem_limit_bytes=vmem_limit,
        ),
        cost_estimate=cost,
    )(x_p, w_p, b_p)

    out = out[:M, :N]
    return out.reshape(*orig_shape[:-1], N)


if __name__ == "__main__":
    key = jax.random.PRNGKey(0)
    kx, kw, kb = jax.random.split(key, 3)

    batch, in_features, out_features = 16, 32, 64

    x = jax.random.normal(kx, (batch, in_features), dtype=jnp.float32)
    # Deterministic parameter init (nn.Linear-style uniform bound 1/sqrt(fan_in)).
    bound = 1.0 / (in_features ** 0.5)
    weight = jax.random.uniform(
        kw, (out_features, in_features), minval=-bound, maxval=bound, dtype=jnp.float32
    )
    bias = jax.random.uniform(
        kb, (out_features,), minval=-bound, maxval=bound, dtype=jnp.float32
    )

    y = meta_linear(x, weight, bias)
    jax.block_until_ready(y)

    # Pure-JAX reference check of the F.linear semantics.
    y_ref = x @ weight.T + bias
    assert y.shape == (batch, out_features)
    assert jnp.allclose(y, y_ref, atol=1e-5, rtol=1e-5)

    # Shape that exercises ragged M/N/K with divisor-aware tiling (no zero-K waste).
    M2, K2, N2 = 300, 384, 200
    x2 = jax.random.normal(kx, (M2, K2), dtype=jnp.float32)
    w2 = jax.random.normal(kw, (N2, K2), dtype=jnp.float32) * 0.05
    b2 = jax.random.normal(kb, (N2,), dtype=jnp.float32) * 0.05
    y2 = meta_linear(x2, w2, b2)
    jax.block_until_ready(y2)
    assert jnp.allclose(y2, x2 @ w2.T + b2, atol=1e-4, rtol=1e-4)

    # 3-D input (leading dims flattened by the wrapper, like F.linear).
    x3 = jax.random.normal(kx, (2, 8, in_features), dtype=jnp.float32)
    y3 = meta_linear(x3, weight, bias)
    jax.block_until_ready(y3)
    assert y3.shape == (2, 8, out_features)
    assert jnp.allclose(y3, x3 @ weight.T + bias, atol=1e-5, rtol=1e-5)

    # Optional bf16 MXU path (f32 accumulation), looser tolerance.
    y2_bf16 = meta_linear(x2, w2, b2, cast_to_bf16=True)
    jax.block_until_ready(y2_bf16)
    assert jnp.allclose(y2_bf16, x2 @ w2.T + b2, atol=1e-1, rtol=1e-1)

    print("KERNEL_OK")
</pallas_src>

<mosaic_0001>
module attributes {stable_mosaic.version = 11 : i64} {
  func.func @_meta_linear_kernel_f32out(%arg0: i32, %arg1: i32, %arg2: i32, %arg3: memref<16x128xf32, #tpu.memory_space<vmem>>, %arg4: memref<128x128xf32, #tpu.memory_space<vmem>>, %arg5: memref<1x128xf32, #tpu.memory_space<vmem>>, %arg6: memref<16x128xf32, #tpu.memory_space<vmem>>) attributes {dimension_semantics = [#tpu.dimension_semantics<parallel>, #tpu.dimension_semantics<parallel>, #tpu.dimension_semantics<arbitrary>], iteration_bounds = array<i64: 1, 1, 1>, scalar_prefetch = 0 : i64, scratch_operands = 0 : i64, tpu.core_type = #tpu.core_type<tc>, window_params = [{transform_indices = @transform_0, window_bounds = array<i64: 16, 128>}, {transform_indices = @transform_1, window_bounds = array<i64: 128, 128>}, {transform_indices = @transform_2, window_bounds = array<i64: 1, 128>}, {transform_indices = @transform_3, window_bounds = array<i64: 16, 128>}]} {
    %c0_i32 = arith.constant 0 : i32
    %0 = arith.cmpi eq, %arg2, %c0_i32 : i32
    %1 = arith.extui %0 : i1 to i32
    %c0_i32_0 = arith.constant 0 : i32
    %2 = arith.cmpi ne, %1, %c0_i32_0 : i32
    scf.if %2 {
      %cst_10 = arith.constant 0.000000e+00 : f32
      %12 = vector.broadcast %cst_10 : f32 to vector<16x128xf32>
      %c0_11 = arith.constant 0 : index
      %c0_12 = arith.constant 0 : index
      %13 = vector.load %arg6[%c0_11, %c0_12] : memref<16x128xf32, #tpu.memory_space<vmem>>, vector<16x128xf32>
      tpu.vector_store %arg6[%c0_11, %c0_12], %12 {strides = array<i32>} : memref<16x128xf32, #tpu.memory_space<vmem>>, vector<16x128xf32>,
    } else {
    }
    %c0 = arith.constant 0 : index
    %c0_1 = arith.constant 0 : index
    %3 = vector.load %arg6[%c0, %c0_1] : memref<16x128xf32, #tpu.memory_space<vmem>>, vector<16x128xf32>
    %c0_2 = arith.constant 0 : index
    %c0_3 = arith.constant 0 : index
    %4 = vector.load %arg3[%c0_2, %c0_3] : memref<16x128xf32, #tpu.memory_space<vmem>>, vector<16x128xf32>
    %c0_4 = arith.constant 0 : index
    %c0_5 = arith.constant 0 : index
    %5 = vector.load %arg4[%c0_4, %c0_5] : memref<128x128xf32, #tpu.memory_space<vmem>>, vector<128x128xf32>
    %cst = arith.constant dense<0.000000e+00> : vector<16x128xf32>
    %6 = tpu.matmul %4, %5, %cst {dimension_numbers = #tpu.dot_dimension_numbers<[1], [1], [0], [0], [0, 0, 1, 0], [], []>} : vector<16x128xf32>, vector<128x128xf32>, vector<16x128xf32> -> vector<16x128xf32>
    %7 = arith.addf %3, %6 : vector<16x128xf32>
    %c0_6 = arith.constant 0 : index
    %c0_7 = arith.constant 0 : index
    %8 = vector.load %arg6[%c0_6, %c0_7] : memref<16x128xf32, #tpu.memory_space<vmem>>, vector<16x128xf32>
    tpu.vector_store %arg6[%c0_6, %c0_7], %7 {strides = array<i32>} : memref<16x128xf32, #tpu.memory_space<vmem>>, vector<16x128xf32>,
    %c0_i32_8 = arith.constant 0 : i32
    %9 = arith.cmpi eq, %arg2, %c0_i32_8 : i32
    %10 = arith.extui %9 : i1 to i32
    %c0_i32_9 = arith.constant 0 : i32
    %11 = arith.cmpi ne, %10, %c0_i32_9 : i32
    scf.if %11 {
      %c0_10 = arith.constant 0 : index
      %c0_11 = arith.constant 0 : index
      %12 = vector.load %arg6[%c0_10, %c0_11] : memref<16x128xf32, #tpu.memory_space<vmem>>, vector<16x128xf32>
      %c0_12 = arith.constant 0 : index
      %c0_13 = arith.constant 0 : index
      %13 = vector.load %arg5[%c0_12, %c0_13] : memref<1x128xf32, #tpu.memory_space<vmem>>, vector<1x128xf32>
      %14 = vector.broadcast %13 : vector<1x128xf32> to vector<16x128xf32>
      %15 = arith.addf %12, %14 : vector<16x128xf32>
      %c0_14 = arith.constant 0 : index
      %c0_15 = arith.constant 0 : index
      %16 = vector.load %arg6[%c0_14, %c0_15] : memref<16x128xf32, #tpu.memory_space<vmem>>, vector<16x128xf32>
      tpu.vector_store %arg6[%c0_14, %c0_15], %15 {strides = array<i32>} : memref<16x128xf32, #tpu.memory_space<vmem>>, vector<16x128xf32>,
    } else {
    }
    return
  }
  func.func @transform_0(%arg0: i32, %arg1: i32, %arg2: i32) -> (i32, i32) {
    %c0_i32 = arith.constant 0 : i32
    return %arg0, %arg2 : i32, i32
  }
  func.func @transform_1(%arg0: i32, %arg1: i32, %arg2: i32) -> (i32, i32) {
    %c0_i32 = arith.constant 0 : i32
    return %arg1, %arg2 : i32, i32
  }
  func.func @transform_2(%arg0: i32, %arg1: i32, %arg2: i32) -> (i32, i32) {
    %c0_i32 = arith.constant 0 : i32
    %c0_i32_0 = arith.constant 0 : i32
    return %c0_i32, %arg1 : i32, i32
  }
  func.func @transform_3(%arg0: i32, %arg1: i32, %arg2: i32) -> (i32, i32) {
    %c0_i32 = arith.constant 0 : i32
    return %arg0, %arg1 : i32, i32
  }
}

</mosaic_0001>

<bundles_post_ra>
// kernel: tpu_custom_call.1
= control target key start
LH: loop header
LB: loop body
LE: loop exit
PB: predicated region body
PF: predicated region fallthrough
CT: control target
= control target key end

     0   :  { %8 = vsyncpa [#allocation3], 0  ;;  %s419_s0 = inlined_call_operand.hbm [shape: f32[16,128], index: 0, kind: input, shape index: {}]   ;;  %s420_s1 = inlined_call_operand.hbm [shape: f32[128,128], index: 1, kind: input, shape index: {}]   ;;  %s421_s2 = inlined_call_operand.vmem [shape: f32[1,128], index: 2, kind: input, shape index: {}]   ;;  %s422_s3 = inlined_call_operand.hbm [shape: f32[16,128], index: 3, kind: output, shape index: {}]  }
   0x1   :  { %9 = vsyncpa [#allocation6], 0 }
   0x2   :  { %10 = vsyncpa [#allocation4], 0  ;;  %s346_s12 = smov [#allocation2]   ;;  %s274_s16 = scalar_lea.hbm %s419_s0, 256 }
   0x3   :  { %s16_s13 = sshll.u32 %s346_s12, 4  ;;  %p275_p0 = scmp.ne.s32.totalorder %s419_s0, %s274_s16  ;;  %s17_s13 = int_to_ptr.vmem [resolvable:$true] %s16_s13 }
   0x4   :  { %p278_p1 = scmp.lt.u32.totalorder %s274_s16, %s419_s0 }
   0x6   :  { %p280_p2 = pnand %p278_p1, %p275_p0 }
   0x8   :  { %283 = shalt.err (!%p280_p2)
}
   0x9   :  { %s284_s21 = scalar_lea.vmem %s17_s13, 256  ;;  %p289_p4 = scmp.lt.s32.totalorder %s17_s13, %s17_s13 }
   0xa   :  { %p285_p3 = scmp.ne.s32.totalorder %s17_s13, %s284_s21  ;;  %p290_p5 = scmp.lt.s32.totalorder %s284_s21, %s284_s21 }
   0xc   :  { %p291_p6 = por %p290_p5, %p289_p4 }
   0xe   :  { %p292_p7 = pnand %p291_p6, %p285_p3 }
  0x10   :  { %295 = shalt.err (!%p292_p7)
}
  0x11   :  { %s347_s22 = smov 128   ;;  %s348_s23 = smov 8  }
  0x12   :  { %22 = dma.hbm_to_vmem [thread:$0]  %s419_s0, 256, %s17_s13, [#allocation3], %s347_s22, %s347_s22, %s348_s23  }
  0x13   :  { %s349_s26 = smov [#allocation5]   ;;  %s296_s30 = scalar_lea.hbm %s420_s1, 2048 }
  0x14   :  { %s28_s27 = sshll.u32 %s349_s26, 4  ;;  %p297_p8 = scmp.ne.s32.totalorder %s420_s1, %s296_s30  ;;  %s29_s27 = int_to_ptr.vmem [resolvable:$true] %s28_s27 }
  0x15   :  { %p300_p9 = scmp.lt.u32.totalorder %s296_s30, %s420_s1 }
  0x17   :  { %p302_p10 = pnand %p300_p9, %p297_p8 }
  0x19   :  { %305 = shalt.err (!%p302_p10)
}
  0x1a   :  { %s306_s8 = scalar_lea.vmem %s29_s27, 2048  ;;  %p311_p12 = scmp.lt.s32.totalorder %s29_s27, %s29_s27 }
  0x1b   :  { %p307_p11 = scmp.ne.s32.totalorder %s29_s27, %s306_s8  ;;  %p312_p13 = scmp.lt.s32.totalorder %s306_s8, %s306_s8 }
  0x1d   :  { %p313_p0 = por %p312_p13, %p311_p12 }
  0x1f   :  { %p314_p1 = pnand %p313_p0, %p307_p11 }
  0x21   :  { %317 = shalt.err (!%p314_p1)
}
  0x22   :  { %34 = dma.hbm_to_vmem [thread:$0]  %s420_s1, 2048, %s29_s27, [#allocation6], %s347_s22, %s347_s22, %s348_s23  }
  0x23   :  { %340 = dma.done.wait [#allocation3], 256  }
  0x24   :  { %341 = vsyncadd [#allocation3], 4294967040 }
  0x25   :  { %342 = dma.done.wait [#allocation6], 2048  }
  0x26   :  { %343 = vsyncadd [#allocation6], 4294965248  ;;  %v53_v0 = vld [vmem:[#allocation5] sm:$0xff]  ;;  %v54_v1 = vld [vmem:[#allocation5 + $0x8] sm:$0xff]  ;;  %s350_s11 = smov [#allocation7]  }
  0x27   :  { %v55_v2 = vld [vmem:[#allocation5 + $0x10] sm:$0xff]  ;;  %v236_v3 = vpack.c.bf16 %v54_v1, %v53_v0  ;;  %v56_v4 = vld [vmem:[#allocation5 + $0x18] sm:$0xff]  ;;  %v57_v7 = vld [vmem:[#allocation5 + $0x20] sm:$0xff]  ;;  %s169_s12 = sshll.u32 %s350_s11, 4  ;;  %s170_s12 = int_to_ptr.vmem [resolvable:$true] %s169_s12 }
  0x28   :  { %v240_v5 = vpack.c.bf16 %v56_v4, %v55_v2  ;;  %v51_v6 = vld [vmem:[#allocation2] sm:$0xff]  ;;  %v58_v8 = vld [vmem:[#allocation5 + $0x28] sm:$0xff]  ;;  %v60_v11 = vld [vmem:[#allocation5 + $0x38] sm:$0xff]  ;;  %s318_s13 = scalar_lea.vmem %s170_s12, 256  ;;  %p323_p3 = scmp.lt.s32.totalorder %s170_s12, %s170_s12 }
  0x29   :  { %237 = vmatprep.subr.bf16.mxu0 %v236_v3  ;;  %233 = vmatprep.mubr.f32.mxu0 %v51_v6  ;;  %v244_v9 = vpack.c.bf16 %v58_v8, %v57_v7  ;;  %v59_v10 = vld [vmem:[#allocation5 + $0x30] sm:$0xff]  ;;  %v61_v13 = vld [vmem:[#allocation5 + $0x40] sm:$0xff]  ;;  %v62_v14 = vld [vmem:[#allocation5 + $0x48] sm:$0xff]  ;;  %p319_p2 = scmp.ne.s32.totalorder %s170_s12, %s318_s13  ;;  %p324_p4 = scmp.lt.s32.totalorder %s318_s13, %s318_s13 }
  0x2a   :  { %239 = vmatpush3.bf16.xpose.msra.mxu0 %v236_v3  ;;  %v248_v12 = vpack.c.bf16 %v60_v11, %v59_v10  ;;  %v252_v15 = vpack.c.bf16 %v62_v14, %v61_v13  ;;  %v63_v16 = vld [vmem:[#allocation5 + $0x50] sm:$0xff]  ;;  %v64_v17 = vld [vmem:[#allocation5 + $0x58] sm:$0xff]  ;;  %v65_v19 = vld [vmem:[#allocation5 + $0x60] sm:$0xff] }
  0x2b   :  { %241 = vmatprep.subr.bf16.mxu0 %v240_v5  ;;  %v256_v18 = vpack.c.bf16 %v64_v17, %v63_v16  ;;  %v66_v20 = vld [vmem:[#allocation5 + $0x68] sm:$0xff]  ;;  %v67_v22 = vld [vmem:[#allocation5 + $0x70] sm:$0xff]  ;;  %v68_v23 = vld [vmem:[#allocation5 + $0x78] sm:$0xff]  ;;  %p325_p5 = por %p324_p4, %p323_p3 }
  0x2c   :  { %v260_v21 = vpack.c.bf16 %v66_v20, %v65_v19  ;;  %v264_v24 = vpack.c.bf16 %v68_v23, %v67_v22  ;;  %v52_v25 = vld [vmem:[#allocation2 + $0x8] sm:$0xff]  ;;  %v182_v27 = vld [vmem:[%s421_s2] ss:$0 sm:$0xff] }
  0x2d   :  { %p326_p6 = pnand %p325_p5, %p319_p2 }
  0x32   :  { %243 = vmatpush3.bf16.xpose.msra.mxu0 %v240_v5 }
  0x33   :  { %245 = vmatprep.subr.bf16.mxu0 %v244_v9 }
  0x3a   :  { %247 = vmatpush3.bf16.xpose.msra.mxu0 %v244_v9 }
  0x3b   :  { %249 = vmatprep.subr.bf16.mxu0 %v248_v12 }
  0x42   :  { %251 = vmatpush3.bf16.xpose.msra.mxu0 %v248_v12 }
  0x43   :  { %253 = vmatprep.subr.bf16.mxu0 %v252_v15 }
  0x4a   :  { %255 = vmatpush3.bf16.xpose.msra.mxu0 %v252_v15 }
  0x4b   :  { %257 = vmatprep.subr.bf16.mxu0 %v256_v18 }
  0x52   :  { %259 = vmatpush3.bf16.xpose.msra.mxu0 %v256_v18 }
  0x53   :  { %261 = vmatprep.subr.bf16.mxu0 %v260_v21 }
  0x5a   :  { %263 = vmatpush3.bf16.xpose.msra.mxu0 %v260_v21 }
  0x5b   :  { %265 = vmatprep.subr.bf16.mxu0 %v264_v24 }
  0x62   :  { %267 = vmatpush3.bf16.xpose.msra.mxu0 %v264_v24 }
  0x69   :  { %234 = vmatmul.mubr.f32.vlgmr.msra.gmra.mrb[0].mxu0 %v52_v25 }
 0x13c   :  { %v235_v26 = vpop.f32.mrb[0].mxu0 }
 0x13d   :  { %v135_v28 = vpop.f32.mrb[1].mxu0  ;;  %v161_v29 = vadd.f32 %v235_v26, %v182_v27 }
 0x13e   :  { %v160_v30 = vadd.f32 %v182_v27, %v135_v28 }
 0x13f   :  { %163 = vst [vmem:[#allocation7 + $0x8] sm:$0xff] %v161_v29 }
 0x140   :  { %162 = vst [vmem:[#allocation7] sm:$0xff] %v160_v30 }
 0x141   :  { %329 = shalt.err (!%p326_p6)
}
 0x142   :  { %s330_s16 = scalar_lea.hbm %s422_s3, 256 }
 0x143   :  { %p331_p7 = scmp.ne.s32.totalorder %s422_s3, %s330_s16  ;;  %p334_p8 = scmp.lt.u32.totalorder %s330_s16, %s422_s3 }
 0x145   :  { %p336_p9 = pnand %p334_p8, %p331_p7 }
 0x147   :  { %339 = shalt.err (!%p336_p9)
}
 0x148   :  { %175 = dma.vmem_to_hbm [thread:$0]  %s170_s12, 256, %s422_s3, [#allocation4], %s347_s22, %s347_s22, %s348_s23  }
 0x149   :  { %344 = dma.done.wait [#allocation4], 256  }
 0x14a   :  { %345 = vsyncadd [#allocation4], 4294967040 }
 0x14b   :  { %179 = vsyncpa [#allocation3], 1 }
 0x14c   :  { %180 = vsyncpa [#allocation6], 1 }
 0x14d   :  { %181 = vsyncpa [#allocation4], 1 }

</bundles_post_ra>
